<compile_context>
chip_gen: v7x
topology: tpu7x:2x2x1
jax: 0.10.0
libtpu: 0.0.40
codegen_flags: <defaults>
</compile_context>

<pallas_src>
import jax
import jax.numpy as jnp
from jax.experimental import pallas as pl
from jax.experimental.pallas import tpu as pltpu


def _round_up(a: int, b: int) -> int:
    return (a + b - 1) // b * b


def _vmem_capacity_bytes() -> int:
    """Physical VMEM of the current chip (conservative fallback = 64 MiB, v7x per-TC)."""
    try:
        cap = int(getattr(pltpu.get_tpu_info(), "vmem_capacity_bytes", 0))
        if cap > 0:
            return cap
    except Exception:
        pass
    return 64 << 20


def _detect_num_tensorcores() -> int:
    """2 on dual-TC chips (v4 / v5p / v7x), else 1 (v5e / v6e)."""
    try:
        kind = jax.devices()[0].device_kind.lower().replace(" ", "")
    except Exception:
        return 1
    return 2 if any(tok in kind for tok in ("v4", "v5p", "v7")) else 1


def _footprint_bytes(tm, d_model, vocab_p, x_itemsize, out_itemsize) -> int:
    """Explicit VMEM footprint: pipelined blocks + f32 intermediates + const scratch."""
    return (
        2 * tm * d_model * x_itemsize        # x blocks (2-deep pipeline, input dtype)
        + 2 * tm * vocab_p * out_itemsize    # out blocks (2-deep pipeline)
        + 2 * tm * vocab_p * 4               # f32 logits + shifted intermediates
        + d_model * vocab_p * 2              # single-buffered bf16 W scratch
        + vocab_p * 4                        # f32 bias scratch
    )


def _proj_logsoftmax_kernel(x_ref, w_hbm, b_hbm, o_ref, w_vmem, b_vmem, dma_sem):
    # x_ref:  (tm, d_model) in the input dtype (auto-pipelined VMEM block)
    # w_hbm:  (d_model, vocab_p) bf16 in HBM (memory_space=ANY)
    # b_hbm:  (1, vocab_p) f32 in HBM (memory_space=ANY)
    # o_ref:  (tm, vocab_p) output block
    # w_vmem / b_vmem: single-buffered VMEM scratch copies of the constants.

    # Start the one-time constant loads (per core: inner grid axis is "arbitrary",
    # so j == 0 runs first on every core owning a slice of the parallel axis) ...
    @pl.when(pl.program_id(1) == 0)
    def _start_const_dma():
        pltpu.make_async_copy(w_hbm, w_vmem, dma_sem.at[0]).start()
        pltpu.make_async_copy(b_hbm, b_vmem, dma_sem.at[1]).start()

    # ... overlap them with the (free, VPU) bf16 cast of the x block ...
    x_bf = x_ref[...].astype(jnp.bfloat16)

    # ... and only block right before the matmul needs W.
    @pl.when(pl.program_id(1) == 0)
    def _wait_const_dma():
        pltpu.make_async_copy(w_hbm, w_vmem, dma_sem.at[0]).wait()
        pltpu.make_async_copy(b_hbm, b_vmem, dma_sem.at[1]).wait()

    # bf16 x bf16 matmul with f32 accumulation on the MXU.
    logits = jnp.dot(x_bf, w_vmem[...], preferred_element_type=jnp.float32)
    logits = logits + b_vmem[...]  # broadcast f32 bias over rows

    # Numerically stable log_softmax over the full (padded) vocab, in f32.
    m = jnp.max(logits, axis=-1, keepdims=True)
    shifted = logits - m
    lse = jnp.log(jnp.sum(jnp.exp(shifted), axis=-1, keepdims=True))
    o_ref[...] = (shifted - lse).astype(o_ref.dtype)


def projection_layer(x, w_t, b, *, tm=256, num_row_splits=None, out_dtype=None):
    """log_softmax(x @ w_t + b, axis=-1).

    x:   (batch, seq, d_model)
    w_t: (d_model, vocab) — pre-transposed Linear weight; pass bf16 to avoid a
         per-call cast pass (cached/cast-once weight).
    b:   (vocab,)
    out_dtype: output dtype (default x.dtype). bf16 halves the dominant output
         HBM writeback at ~1e-3 absolute cost on the stored log-probs.
    """
    batch, seq, d_model = x.shape
    vocab = w_t.shape[1]
    n_rows = batch * seq
    out_dtype = x.dtype if out_dtype is None else jnp.dtype(out_dtype)

    if num_row_splits is None:
        num_row_splits = _detect_num_tensorcores()

    # Lane-dense (multiple of 128) vocab for unmasked output stores.
    vocab_p = _round_up(vocab, 128)

    # MXU-filling row tile (multiple of 128), shrunk to fit physical VMEM.
    vmem_cap = _vmem_capacity_bytes()
    budget = int(0.9 * (vmem_cap - (6 << 20)))
    x_itemsize = jnp.dtype(x.dtype).itemsize
    out_itemsize = out_dtype.itemsize
    tm_eff = max(128, min(_round_up(tm, 128), _round_up(n_rows, 128)))
    while tm_eff > 128 and _footprint_bytes(tm_eff, d_model, vocab_p, x_itemsize, out_itemsize) > budget:
        tm_eff -= 128

    # Pad rows so the grid is exactly (num_row_splits, tiles_per_split).
    rows_padded = _round_up(n_rows, tm_eff * num_row_splits)
    tiles_per_split = rows_padded // (tm_eff * num_row_splits)

    x2 = x.reshape(n_rows, d_model)
    if rows_padded != n_rows:
        x2 = jnp.pad(x2, ((0, rows_padded - n_rows), (0, 0)))

    # Weight: use as-is if already bf16 (cached); otherwise cast once here.
    w_bf = w_t if w_t.dtype == jnp.bfloat16 else w_t.astype(jnp.bfloat16)
    b2 = b.reshape(1, vocab).astype(jnp.float32)
    if vocab_p != vocab:
        # Padded vocab columns: zero weights + -1e30 bias => exp ~ 0, no effect on
        # the real columns' normalization; padded outputs are sliced off below.
        w_bf = jnp.pad(w_bf, ((0, 0), (0, vocab_p - vocab)))
        b2 = jnp.pad(b2, ((0, 0), (0, vocab_p - vocab)), constant_values=-1e30)

    footprint = _footprint_bytes(tm_eff, d_model, vocab_p, x_itemsize, out_itemsize)
    vmem_limit = int(min(1.25 * footprint + (4 << 20), vmem_cap - (2 << 20)))

    def row_map(c, j):
        return (c * tiles_per_split + j, 0)

    out = pl.pallas_call(
        _proj_logsoftmax_kernel,
        out_shape=jax.ShapeDtypeStruct((rows_padded, vocab_p), out_dtype),
        grid_spec=pltpu.PrefetchScalarGridSpec(
            num_scalar_prefetch=0,
            grid=(num_row_splits, tiles_per_split),
            in_specs=[
                pl.BlockSpec((tm_eff, d_model), row_map),
                pl.BlockSpec(memory_space=pl.ANY),   # weights: stay in HBM, DMA'd once per core
                pl.BlockSpec(memory_space=pl.ANY),   # bias:    stay in HBM, DMA'd once per core
            ],
            out_specs=pl.BlockSpec((tm_eff, vocab_p), row_map),
            scratch_shapes=[
                pltpu.VMEM((d_model, vocab_p), jnp.bfloat16),  # single-buffered W
                pltpu.VMEM((1, vocab_p), jnp.float32),         # single-buffered bias
                pltpu.SemaphoreType.DMA((2,)),
            ],
        ),
        compiler_params=pltpu.CompilerParams(
            dimension_semantics=("parallel", "arbitrary"),
            vmem_limit_bytes=vmem_limit,
        ),
    )(x2, w_bf, b2)

    out = out[:n_rows, :vocab]
    return out.reshape(batch, seq, vocab)


if __name__ == "__main__":
    # Small shapes consistent with the module: (batch=2, seq=8, d_model=32) -> vocab=128
    batch, seq, d_model, vocab = 2, 8, 32, 128
    key = jax.random.PRNGKey(0)
    kx, kw, kb = jax.random.split(key, 3)

    x = jax.random.normal(kx, (batch, seq, d_model), dtype=jnp.float32)
    # nn.Linear(d_model, vocab): weight (vocab, d_model), bias (vocab,),
    # initialized like PyTorch: uniform(-1/sqrt(d_model), 1/sqrt(d_model)).
    bound = 1.0 / (d_model ** 0.5)
    w = jax.random.uniform(kw, (vocab, d_model), dtype=jnp.float32, minval=-bound, maxval=bound)
    b = jax.random.uniform(kb, (vocab,), dtype=jnp.float32, minval=-bound, maxval=bound)
    w_t = w.T                                   # (d_model, vocab)
    w_t_bf = w_t.astype(jnp.bfloat16)           # cast-once cached weight (review item)

    # Default path: output in the input dtype (f32), matching the module semantics.
    out = projection_layer(x, w_t_bf, b)
    jax.block_until_ready(out)

    ref = jax.nn.log_softmax(x @ w_t + b, axis=-1)
    assert out.shape == (batch, seq, vocab)
    assert jnp.allclose(out, ref, atol=5e-2, rtol=0.0), float(jnp.max(jnp.abs(out - ref)))
    assert jnp.allclose(jax.scipy.special.logsumexp(out, axis=-1), 0.0, atol=1e-3)

    # Bandwidth-optimized path: bf16 log-prob output (half the HBM writeback).
    out_bf = projection_layer(x, w_t_bf, b, out_dtype=jnp.bfloat16)
    jax.block_until_ready(out_bf)
    assert out_bf.dtype == jnp.bfloat16
    assert jnp.allclose(out_bf.astype(jnp.float32), ref, atol=1.5e-1, rtol=0.0)

    print("KERNEL_OK")
</pallas_src>

<mosaic_0001>
module attributes {stable_mosaic.version = 11 : i64} {
  func.func @_proj_logsoftmax_kernel(%arg0: i32, %arg1: i32, %arg2: memref<128x32xf32, #tpu.memory_space<vmem>>, %arg3: memref<32x128xbf16, #tpu.memory_space<any>>, %arg4: memref<1x128xf32, #tpu.memory_space<any>>, %arg5: memref<128x128xf32, #tpu.memory_space<vmem>>, %arg6: memref<32x128xbf16, #tpu.memory_space<vmem>>, %arg7: memref<1x128xf32, #tpu.memory_space<vmem>>, %arg8: memref<2x!tpu.dma_semaphore, #tpu.memory_space<semaphore_mem>>) attributes {dimension_semantics = [#tpu.dimension_semantics<parallel>, #tpu.dimension_semantics<arbitrary>], iteration_bounds = array<i64: 1, 1>, scalar_prefetch = 0 : i64, scratch_operands = 3 : i64, tpu.core_type = #tpu.core_type<tc>, window_params = [{transform_indices = @transform_0, window_bounds = array<i64: 128, 32>}, {}, {}, {transform_indices = @transform_3, window_bounds = array<i64: 128, 128>}]} {
    %c0_i32 = arith.constant 0 : i32
    %0 = arith.cmpi eq, %arg1, %c0_i32 : i32
    %1 = arith.extui %0 : i1 to i32
    %c0_i32_0 = arith.constant 0 : i32
    %2 = arith.cmpi ne, %1, %c0_i32_0 : i32
    scf.if %2 {
      %c0_i32_12 = arith.constant 0 : i32
      %24 = tpu.memref_slice %arg8[%c0_i32_12] : memref<2x!tpu.dma_semaphore, #tpu.memory_space<semaphore_mem>> -> memref<1x!tpu.dma_semaphore, #tpu.memory_space<semaphore_mem>>
      %25 = tpu.memref_squeeze %24 : memref<1x!tpu.dma_semaphore, #tpu.memory_space<semaphore_mem>> -> memref<!tpu.dma_semaphore, #tpu.memory_space<semaphore_mem>>
      tpu.enqueue_dma source(%arg3 : memref<32x128xbf16, #tpu.memory_space<any>>) target(%arg6 : memref<32x128xbf16, #tpu.memory_space<vmem>>) target_semaphore(%25 : memref<!tpu.dma_semaphore, #tpu.memory_space<semaphore_mem>>)
      %c1_i32 = arith.constant 1 : i32
      %26 = tpu.memref_slice %arg8[%c1_i32] : memref<2x!tpu.dma_semaphore, #tpu.memory_space<semaphore_mem>> -> memref<1x!tpu.dma_semaphore, #tpu.memory_space<semaphore_mem>>
      %27 = tpu.memref_squeeze %26 : memref<1x!tpu.dma_semaphore, #tpu.memory_space<semaphore_mem>> -> memref<!tpu.dma_semaphore, #tpu.memory_space<semaphore_mem>>
      tpu.enqueue_dma source(%arg4 : memref<1x128xf32, #tpu.memory_space<any>>) target(%arg7 : memref<1x128xf32, #tpu.memory_space<vmem>>) target_semaphore(%27 : memref<!tpu.dma_semaphore, #tpu.memory_space<semaphore_mem>>)
    } else {
    }
    %c0 = arith.constant 0 : index
    %c0_1 = arith.constant 0 : index
    %3 = vector.load %arg2[%c0, %c0_1] : memref<128x32xf32, #tpu.memory_space<vmem>>, vector<128x32xf32>
    %4 = arith.truncf %3 : vector<128x32xf32> to vector<128x32xbf16>
    %c0_i32_2 = arith.constant 0 : i32
    %5 = arith.cmpi eq, %arg1, %c0_i32_2 : i32
    %6 = arith.extui %5 : i1 to i32
    %c0_i32_3 = arith.constant 0 : i32
    %7 = arith.cmpi ne, %6, %c0_i32_3 : i32
    scf.if %7 {
      %c0_i32_12 = arith.constant 0 : i32
      %24 = tpu.memref_slice %arg8[%c0_i32_12] : memref<2x!tpu.dma_semaphore, #tpu.memory_space<semaphore_mem>> -> memref<1x!tpu.dma_semaphore, #tpu.memory_space<semaphore_mem>>
      %25 = tpu.memref_squeeze %24 : memref<1x!tpu.dma_semaphore, #tpu.memory_space<semaphore_mem>> -> memref<!tpu.dma_semaphore, #tpu.memory_space<semaphore_mem>>
      tpu.wait_dma2 semaphore(%25 : memref<!tpu.dma_semaphore, #tpu.memory_space<semaphore_mem>>) src(%arg3 : memref<32x128xbf16, #tpu.memory_space<any>>) dst(%arg6 : memref<32x128xbf16, #tpu.memory_space<vmem>>)
      %c1_i32 = arith.constant 1 : i32
      %26 = tpu.memref_slice %arg8[%c1_i32] : memref<2x!tpu.dma_semaphore, #tpu.memory_space<semaphore_mem>> -> memref<1x!tpu.dma_semaphore, #tpu.memory_space<semaphore_mem>>
      %27 = tpu.memref_squeeze %26 : memref<1x!tpu.dma_semaphore, #tpu.memory_space<semaphore_mem>> -> memref<!tpu.dma_semaphore, #tpu.memory_space<semaphore_mem>>
      tpu.wait_dma2 semaphore(%27 : memref<!tpu.dma_semaphore, #tpu.memory_space<semaphore_mem>>) src(%arg4 : memref<1x128xf32, #tpu.memory_space<any>>) dst(%arg7 : memref<1x128xf32, #tpu.memory_space<vmem>>)
    } else {
    }
    %c0_4 = arith.constant 0 : index
    %c0_5 = arith.constant 0 : index
    %8 = vector.load %arg6[%c0_4, %c0_5] : memref<32x128xbf16, #tpu.memory_space<vmem>>, vector<32x128xbf16>
    %cst = arith.constant dense<0.000000e+00> : vector<128x128xf32>
    %9 = tpu.matmul %4, %8, %cst {dimension_numbers = #tpu.dot_dimension_numbers<[1], [0], [0], [1], [0, 0, 1, 1], [], []>} : vector<128x32xbf16>, vector<32x128xbf16>, vector<128x128xf32> -> vector<128x128xf32>
    %c0_6 = arith.constant 0 : index
    %c0_7 = arith.constant 0 : index
    %10 = vector.load %arg7[%c0_6, %c0_7] : memref<1x128xf32, #tpu.memory_space<vmem>>, vector<1x128xf32>
    %11 = vector.broadcast %10 : vector<1x128xf32> to vector<128x128xf32>
    %12 = arith.addf %9, %11 : vector<128x128xf32>
    %cst_8 = arith.constant dense<0xFF800000> : vector<128xf32>
    %13 = vector.multi_reduction <maximumf>, %12, %cst_8 [1] : vector<128x128xf32> to vector<128xf32>
    %14 = vector.shape_cast %13 : vector<128xf32> to vector<128x1xf32>
    %15 = vector.broadcast %14 : vector<128x1xf32> to vector<128x128xf32>
    %16 = arith.subf %12, %15 : vector<128x128xf32>
    %17 = math.exp %16 : vector<128x128xf32>
    %cst_9 = arith.constant dense<0.000000e+00> : vector<128xf32>
    %18 = vector.multi_reduction <add>, %17, %cst_9 [1] : vector<128x128xf32> to vector<128xf32>
    %19 = vector.shape_cast %18 : vector<128xf32> to vector<128x1xf32>
    %20 = math.log %19 : vector<128x1xf32>
    %21 = vector.broadcast %20 : vector<128x1xf32> to vector<128x128xf32>
    %22 = arith.subf %16, %21 : vector<128x128xf32>
    %c0_10 = arith.constant 0 : index
    %c0_11 = arith.constant 0 : index
    %23 = vector.load %arg5[%c0_10, %c0_11] : memref<128x128xf32, #tpu.memory_space<vmem>>, vector<128x128xf32>
    tpu.vector_store %arg5[%c0_10, %c0_11], %22 {strides = array<i32>} : memref<128x128xf32, #tpu.memory_space<vmem>>, vector<128x128xf32>,
    return
  }
  func.func @transform_0(%arg0: i32, %arg1: i32) -> (i32, i32) {
    %c1_i32 = arith.constant 1 : i32
    %0 = arith.muli %arg0, %c1_i32 : i32
    %1 = arith.addi %0, %arg1 : i32
    %c0_i32 = arith.constant 0 : i32
    %c0_i32_0 = arith.constant 0 : i32
    return %1, %c0_i32 : i32, i32
  }
  func.func @transform_3(%arg0: i32, %arg1: i32) -> (i32, i32) {
    %c1_i32 = arith.constant 1 : i32
    %0 = arith.muli %arg0, %c1_i32 : i32
    %1 = arith.addi %0, %arg1 : i32
    %c0_i32 = arith.constant 0 : i32
    %c0_i32_0 = arith.constant 0 : i32
    return %1, %c0_i32 : i32, i32
  }
}

</mosaic_0001>

<bundles_post_ra>
// kernel: tpu_custom_call.1
= control target key start
LH: loop header
LB: loop body
LE: loop exit
PB: predicated region body
PF: predicated region fallthrough
CT: control target
= control target key end

     0   :  { %8 = vsyncpa [#allocation6], 0  ;;  %s848_s0 = inlined_call_operand.vmem [shape: f32[128,32], index: 0, kind: input, shape index: {}]   ;;  %s849_s1 = inlined_call_operand.vmem [shape: bf16[32,128], index: 1, kind: input, shape index: {}]   ;;  %s850_s2 = inlined_call_operand.vmem [shape: f32[1,128], index: 2, kind: input, shape index: {}]   ;;  %s851_s3 = inlined_call_operand.hbm [shape: f32[128,128], index: 3, kind: output, shape index: {}]  }
   0x1   :  { %v72_v0 = vld [vmem:[%s849_s1] sm:$0xff]  ;;  %v74_v1 = vld [vmem:[%s849_s1 + $0x8] sm:$0xff] }
   0x2   :  { %83 = vsyncadd [#allocation4], 256  ;;  %v102_v2 = vld [vmem:[%s850_s2] sm:$0x1] }
   0x3   :  { %103 = vst [vmem:[#allocation3] sm:$0x1] %v102_v2 }
   0x4   :  { %128 = vsyncadd [#allocation4 + $0x1], 16  ;;  %v129_v3 = vld [vmem:[%s848_s0] sm:$0xff]  ;;  %v130_v4 = vld [vmem:[%s848_s0 + $0x8] sm:$0xff] }
   0x5   :  { %v131_v5 = vld [vmem:[%s848_s0 + $0x10] sm:$0xff]  ;;  %v132_v6 = vld [vmem:[%s848_s0 + $0x18] sm:$0xff]  ;;  %v133_v7 = vld [vmem:[%s848_s0 + $0x20] sm:$0xff]  ;;  %v145_v8 = vpack.c.bf16 %v130_v4, %v129_v3 }
   0x6   :  { %v134_v9 = vld [vmem:[%s848_s0 + $0x28] sm:$0xff]  ;;  %v135_v10 = vld [vmem:[%s848_s0 + $0x30] sm:$0xff]  ;;  %v136_v11 = vld [vmem:[%s848_s0 + $0x38] sm:$0xff]  ;;  %v146_v12 = vpack.c.bf16 %v132_v6, %v131_v5 }
   0x7   :  { %v137_v13 = vld [vmem:[%s848_s0 + $0x40] sm:$0xff]  ;;  %v138_v14 = vld [vmem:[%s848_s0 + $0x48] sm:$0xff]  ;;  %v139_v15 = vld [vmem:[%s848_s0 + $0x50] sm:$0xff]  ;;  %v147_v16 = vpack.c.bf16 %v134_v9, %v133_v7  ;;  %v148_v17 = vpack.c.bf16 %v136_v11, %v135_v10 }
   0x8   :  { %v140_v18 = vld [vmem:[%s848_s0 + $0x58] sm:$0xff]  ;;  %v141_v19 = vld [vmem:[%s848_s0 + $0x60] sm:$0xff]  ;;  %v142_v20 = vld [vmem:[%s848_s0 + $0x68] sm:$0xff]  ;;  %v149_v21 = vpack.c.bf16 %v138_v14, %v137_v13 }
   0x9   :  { %v143_v22 = vld [vmem:[%s848_s0 + $0x70] sm:$0xff]  ;;  %v144_v23 = vld [vmem:[%s848_s0 + $0x78] sm:$0xff]  ;;  %v150_v24 = vpack.c.bf16 %v140_v18, %v139_v15  ;;  %v151_v25 = vpack.c.bf16 %v142_v20, %v141_v19 }
   0xa   :  { %v152_v26 = vpack.c.bf16 %v144_v23, %v143_v22 }
   0xb   :  { %662 = dma.done.wait [#allocation4], 256 }
   0xc   :  { %663 = vsyncadd [#allocation4], 4294967040  ;;  %549 = vmatprep.subr.bf16.mxu0 %v72_v0  ;;  %569 = vmatprep.subr.bf16.mxu1 %v72_v0  ;;  %vm173_vm0 = vcmask 261120  }
   0xd   :  { %664 = dma.done.wait [#allocation4 + $0x1], 16 }
   0xe   :  { %665 = vsyncadd [#allocation4 + $0x1], 4294967280  ;;  %550 = vmatpush3.bf16.msra.mxu0 %v72_v0  ;;  %571 = vmatpush3.bf16.msra.mxu1 %v72_v0  ;;  %v528_v27 = vld [vmem:[#allocation3] ss:$0 sm:$0xff]  ;;  %s668_s0 = smov [#allocation5]  }
   0xf   :  { %551 = vmatprep.subr.bf16.mxu0 %v74_v1  ;;  %570 = vmatprep.subr.bf16.mxu1 %v74_v1  ;;  %s480_s21 = sshll.u32 %s668_s0, 4  ;;  %s481_s21 = int_to_ptr.vmem [resolvable:$true] %s480_s21 }
  0x10   :  { %553 = vmatprep.mubr.msk.bf16.mxu0 %vm173_vm0, %v145_v8  ;;  %561 = vmatprep.mubr.msk.bf16.mxu1 %vm173_vm0, %v149_v21  ;;  %s640_s22 = scalar_lea.vmem %s481_s21, 2048  ;;  %p645_p1 = scmp.lt.s32.totalorder %s481_s21, %s481_s21 }
  0x11   :  { %p641_p0 = scmp.ne.s32.totalorder %s481_s21, %s640_s22  ;;  %p646_p2 = scmp.lt.s32.totalorder %s640_s22, %s640_s22 }
  0x12   :  { %552 = vmatpush3.bf16.msra.mxu0 %v74_v1  ;;  %572 = vmatpush3.bf16.msra.mxu1 %v74_v1 }
  0x13   :  { %p647_p3 = por %p646_p2, %p645_p1 }
  0x15   :  { %554 = vmatmul.mubr.msk.bf16.vlgmr.msra.gmra.mrb[0].mxu0 %vm173_vm0, %v146_v12  ;;  %562 = vmatmul.mubr.msk.bf16.vlgmr.msra.gmra.mrb[0].mxu1 %vm173_vm0, %v150_v24  ;;  %p648_p4 = pnand %p647_p3, %p641_p0 }
  0x16   :  { %557 = vmatprep.mubr.msk.bf16.mxu0 %vm173_vm0, %v147_v16  ;;  %565 = vmatprep.mubr.msk.bf16.mxu1 %vm173_vm0, %v151_v25 }
  0x1d   :  { %558 = vmatmul.mubr.msk.bf16.gmra.mrb[4].mxu0 %vm173_vm0, %v148_v17  ;;  %566 = vmatmul.mubr.msk.bf16.gmra.mrb[4].mxu1 %vm173_vm0, %v152_v26 }
  0xe8   :  { %v555_v28 = vpop.f32.mrb[0].mxu0  ;;  %v563_v29 = vpop.f32.mrb[0].mxu1 }
  0xe9   :  { %v241_v30 = vadd.f32 %v555_v28, %v528_v27  ;;  %v273_v31 = vadd.f32 %v563_v29, %v528_v27  ;;  %v232_v32 = vpop.f32.mrb[1].mxu0  ;;  %v264_v33 = vpop.f32.mrb[1].mxu1 }
  0xea   :  { %v556_v34 = vpop.f32.mrb[2].mxu0  ;;  %v564_v35 = vpop.f32.mrb[2].mxu1  ;;  %v233_v38 = vadd.f32 %v528_v27, %v232_v32  ;;  %v265_v42 = vadd.f32 %v528_v27, %v264_v33 }
  0xeb   :  { %v235_v36 = vpop.f32.mrb[3].mxu0  ;;  %v267_v37 = vpop.f32.mrb[3].mxu1  ;;  %315 = vmax.xlane.f32.xlu0 %v273_v31  ;;  %299 = vmax.xlane.f32.xlu1 %v241_v30  ;;  %v244_v39 = vadd.f32 %v556_v34, %v528_v27  ;;  %v276_v43 = vadd.f32 %v564_v35, %v528_v27 }
  0xec   :  { %v236_v50 = vadd.f32 %v528_v27, %v235_v36  ;;  %v268_v51 = vadd.f32 %v528_v27, %v267_v37 }
  0xef   :  { %301 = vmax.xlane.f32.xlu1 %v244_v39  ;;  %295 = vmax.xlane.f32.xlu0 %v233_v38 }
  0xf0   :  { %v559_v40 = vpop.f32.mrb[4].mxu0  ;;  %v567_v41 = vpop.f32.mrb[4].mxu1 }
  0xf1   :  { %v248_v44 = vpop.f32.mrb[5].mxu0  ;;  %v280_v45 = vpop.f32.mrb[5].mxu1  ;;  %v257_v52 = vadd.f32 %v559_v40, %v528_v27  ;;  %v762_v58 = vadd.f32 %v567_v41, %v528_v27 }
  0xf2   :  { %v560_v46 = vpop.f32.mrb[6].mxu0  ;;  %v568_v47 = vpop.f32.mrb[6].mxu1  ;;  %v249_v54 = vadd.f32 %v528_v27, %v248_v44  ;;  %v756_v56 = vadd.f32 %v528_v27, %v280_v45 }
  0xf3   :  { %317 = vmax.xlane.f32.xlu1 %v276_v43  ;;  %311 = vmax.xlane.f32.xlu0 %v265_v42  ;;  %v251_v48 = vpop.f32.mrb[7].mxu0  ;;  %v283_v49 = vpop.f32.mrb[7].mxu1  ;;  %v260_v53 = vadd.f32 %v560_v46, %v528_v27  ;;  %v764_v59 = vadd.f32 %v568_v47, %v528_v27 }
  0xf4   :  { %v252_v55 = vadd.f32 %v528_v27, %v251_v48  ;;  %v758_v57 = vadd.f32 %v528_v27, %v283_v49 }
  0xf7   :  { %313 = vmax.xlane.f32.xlu1 %v268_v51  ;;  %297 = vmax.xlane.f32.xlu0 %v236_v50 }
  0xfb   :  { %309 = vmax.xlane.f32.xlu1 %v260_v53  ;;  %307 = vmax.xlane.f32.xlu0 %v257_v52 }
  0xff   :  { %305 = vmax.xlane.f32.xlu1 %v252_v55  ;;  %303 = vmax.xlane.f32.xlu0 %v249_v54 }
 0x103   :  { %321 = vmax.xlane.f32.xlu1 %v758_v57  ;;  %319 = vmax.xlane.f32.xlu0 %v756_v56 }
 0x107   :  { %325 = vmax.xlane.f32.xlu1 %v764_v59  ;;  %323 = vmax.xlane.f32.xlu0 %v762_v58 }
 0x178   :  { %v316_v60 = vpop.xlane.xlu0 %315  ;;  %v300_v61 = vpop.xlane.xlu1 %299 }
 0x179   :  { %v768_v62 = vsub.f32 %v241_v30, %v300_v61  ;;  %v770_v63 = vsub.f32 %v273_v31, %v316_v60 }
 0x17b   :  { %v347_v0 = vmul.f32 1.442695, %v768_v62  ;;  %v363_v4 = vmul.f32 1.442695, %v770_v63 }
 0x17c   :  { %v302_v1 = vpop.xlane.xlu1 %301  ;;  %v296_v2 = vpop.xlane.xlu0 %295 }
 0x17d   :  { %v773_v3 = vsub.f32 %v244_v39, %v302_v1  ;;  %576 = vpow2.f32 %v347_v0  ;;  %v776_v5 = vsub.f32 %v233_v38, %v296_v2 }
 0x17f   :  { %v349_v6 = vmul.f32 1.442695, %v773_v3  ;;  %v343_v11 = vmul.f32 1.442695, %v776_v5 }
 0x180   :  { %v318_v7 = vpop.xlane.xlu1 %317  ;;  %v312_v8 = vpop.xlane.xlu0 %311 }
 0x181   :  { %578 = vpow2.f32 %v349_v6  ;;  %v779_v9 = vsub.f32 %v276_v43, %v318_v7  ;;  %v781_v10 = vsub.f32 %v265_v42, %v312_v8 }
 0x182   :  { %580 = vpow2.f32 %v363_v4 }
 0x183   :  { %v365_v12 = vmul.f32 1.442695, %v779_v9  ;;  %v359_v15 = vmul.f32 1.442695, %v781_v10 }
 0x184   :  { %v314_v13 = vpop.xlane.xlu1 %313  ;;  %v298_v14 = vpop.xlane.xlu0 %297 }
 0x185   :  { %582 = vpow2.f32 %v365_v12  ;;  %v786_v16 = vsub.f32 %v268_v51, %v314_v13  ;;  %v788_v17 = vsub.f32 %v236_v50, %v298_v14 }
 0x186   :  { %584 = vpow2.f32 %v343_v11 }
 0x187   :  { %v345_v18 = vmul.f32 1.442695, %v788_v17  ;;  %v577_v19 = vpop.eup %576  ;;  %586 = vpow2.f32 %v359_v15  ;;  %v361_v22 = vmul.f32 1.442695, %v786_v16 }
 0x188   :  { %v310_v20 = vpop.xlane.xlu1 %309  ;;  %v308_v21 = vpop.xlane.xlu0 %307  ;;  %379 = vadd.xlane.f32.xlu0 %v577_v19 }
 0x189   :  { %v792_v23 = vsub.f32 %v260_v53, %v310_v20  ;;  %v794_v24 = vsub.f32 %v257_v52, %v308_v21  ;;  %588 = vpow2.f32 %v345_v18 }
 0x18a   :  { %590 = vpow2.f32 %v361_v22 }
 0x18b   :  { %v579_v25 = vpop.eup %578  ;;  %v355_v26 = vmul.f32 1.442695, %v794_v24  ;;  %v357_v30 = vmul.f32 1.442695, %v792_v23 }
 0x18c   :  { %v581_v27 = vpop.eup %580  ;;  %381 = vadd.xlane.f32.xlu1 %v579_v25  ;;  %v306_v28 = vpop.xlane.xlu1 %305 }
 0x18d   :  { %v304_v29 = vpop.xlane.xlu0 %303  ;;  %v798_v31 = vsub.f32 %v252_v55, %v306_v28  ;;  %395 = vadd.xlane.f32.xlu0 %v581_v27  ;;  %592 = vpow2.f32 %v355_v26 }
 0x18e   :  { %v800_v32 = vsub.f32 %v249_v54, %v304_v29  ;;  %594 = vpow2.f32 %v357_v30 }
 0x18f   :  { %v583_v33 = vpop.eup %582  ;;  %v353_v38 = vmul.f32 1.442695, %v798_v31 }
 0x190   :  { %v351_v34 = vmul.f32 1.442695, %v800_v32  ;;  %v585_v35 = vpop.eup %584  ;;  %397 = vadd.xlane.f32.xlu1 %v583_v33  ;;  %v322_v36 = vpop.xlane.xlu1 %321 }
 0x191   :  { %v320_v37 = vpop.xlane.xlu0 %319  ;;  %v805_v39 = vsub.f32 %v758_v57, %v322_v36  ;;  %375 = vadd.xlane.f32.xlu0 %v585_v35  ;;  %v587_v41 = vpop.eup %586 }
 0x192   :  { %v808_v40 = vsub.f32 %v756_v56, %v320_v37  ;;  %596 = vpow2.f32 %v351_v34 }
 0x193   :  { %v589_v43 = vpop.eup %588  ;;  %598 = vpow2.f32 %v353_v38  ;;  %v369_v46 = vmul.f32 1.442695, %v805_v39 }
 0x194   :  { %v367_v42 = vmul.f32 1.442695, %v808_v40  ;;  %v326_v44 = vpop.xlane.xlu1 %325  ;;  %377 = vadd.xlane.f32.xlu1 %v589_v43  ;;  %v591_v49 = vpop.eup %590 }
 0x195   :  { %v324_v45 = vpop.xlane.xlu0 %323  ;;  %391 = vadd.xlane.f32.xlu0 %v587_v41  ;;  %v816_v48 = vsub.f32 %v764_v59, %v326_v44 }
 0x196   :  { %v813_v47 = vsub.f32 %v762_v58, %v324_v45  ;;  %600 = vpow2.f32 %v367_v42 }
 0x197   :  { %v593_v51 = vpop.eup %592  ;;  %602 = vpow2.f32 %v369_v46  ;;  %v373_v52 = vmul.f32 1.442695, %v816_v48 }
 0x198   :  { %v371_v50 = vmul.f32 1.442695, %v813_v47  ;;  %393 = vadd.xlane.f32.xlu1 %v591_v49  ;;  %v595_v53 = vpop.eup %594 }
 0x199   :  { %387 = vadd.xlane.f32.xlu0 %v593_v51 }
 0x19a   :  { %604 = vpow2.f32 %v371_v50 }
 0x19b   :  { %606 = vpow2.f32 %v373_v52 }
 0x19c   :  { %v597_v54 = vpop.eup %596  ;;  %389 = vadd.xlane.f32.xlu1 %v595_v53 }
 0x19d   :  { %383 = vadd.xlane.f32.xlu0 %v597_v54  ;;  %v599_v55 = vpop.eup %598 }
 0x1a0   :  { %v601_v56 = vpop.eup %600  ;;  %385 = vadd.xlane.f32.xlu1 %v599_v55 }
 0x1a1   :  { %399 = vadd.xlane.f32.xlu0 %v601_v56  ;;  %v603_v57 = vpop.eup %602 }
 0x1a4   :  { %v605_v58 = vpop.eup %604  ;;  %401 = vadd.xlane.f32.xlu1 %v603_v57 }
 0x1a5   :  { %403 = vadd.xlane.f32.xlu0 %v605_v58  ;;  %v607_v59 = vpop.eup %606 }
 0x1a8   :  { %405 = vadd.xlane.f32.xlu1 %v607_v59 }
 0x215   :  { %v380_v60 = vpop.xlane.xlu0 %379 }
 0x216   :  { %608 = vlog2.f32 %v380_v60 }
 0x219   :  { %v382_v61 = vpop.xlane.xlu1 %381 }
 0x21a   :  { %610 = vlog2.f32 %v382_v61  ;;  %v396_v0 = vpop.xlane.xlu0 %395 }
 0x21b   :  { %612 = vlog2.f32 %v396_v0 }
 0x21d   :  { %v398_v1 = vpop.xlane.xlu1 %397 }
 0x21e   :  { %614 = vlog2.f32 %v398_v1  ;;  %v376_v2 = vpop.xlane.xlu0 %375 }
 0x21f   :  { %616 = vlog2.f32 %v376_v2 }
 0x220   :  { %v609_v4 = vpop.eup %608 }
 0x221   :  { %v412_v6 = vmul.f32 0.6931472, %v609_v4  ;;  %v378_v7 = vpop.xlane.xlu1 %377 }
 0x222   :  { %v392_v8 = vpop.xlane.xlu0 %391  ;;  %618 = vlog2.f32 %v378_v7 }
 0x223   :  { %v441_v12 = vsub.f32 %v768_v62, %v412_v6  ;;  %620 = vlog2.f32 %v392_v8 }
 0x224   :  { %v611_v11 = vpop.eup %610 }
 0x225   :  { %v613_v13 = vpop.eup %612  ;;  %v414_v14 = vmul.f32 0.6931472, %v611_v11  ;;  %457 = vst [vmem:[#allocation5 + $0x10] sm:$0xff] %v441_v12  ;;  %v394_v18 = vpop.xlane.xlu1 %393 }
 0x226   :  { %v428_v15 = vmul.f32 0.6931472, %v613_v13  ;;  %v388_v19 = vpop.xlane.xlu0 %387  ;;  %622 = vlog2.f32 %v394_v18 }
 0x227   :  { %v442_v20 = vsub.f32 %v773_v3, %v414_v14  ;;  %624 = vlog2.f32 %v388_v19 }
 0x228   :  { %v615_v21 = vpop.eup %614  ;;  %v449_v22 = vsub.f32 %v770_v63, %v428_v15 }
 0x229   :  { %v617_v25 = vpop.eup %616  ;;  %458 = vst [vmem:[#allocation5 + $0x18] sm:$0xff] %v442_v20  ;;  %v430_v26 = vmul.f32 0.6931472, %v615_v21  ;;  %v390_v62 = vpop.xlane.xlu1 %389 }
 0x22a   :  { %465 = vst [vmem:[#allocation5 + $0x50] sm:$0xff] %v449_v22  ;;  %v408_v27 = vmul.f32 0.6931472, %v617_v25  ;;  %v384_v28 = vpop.xlane.xlu0 %383  ;;  %626 = vlog2.f32 %v390_v62 }
 0x22b   :  { %v450_v29 = vsub.f32 %v779_v9, %v430_v26  ;;  %628 = vlog2.f32 %v384_v28 }
 0x22c   :  { %v439_v30 = vsub.f32 %v776_v5, %v408_v27  ;;  %v619_v33 = vpop.eup %618 }
 0x22d   :  { %466 = vst [vmem:[#allocation5 + $0x58] sm:$0xff] %v450_v29  ;;  %v621_v3 = vpop.eup %620  ;;  %v410_v34 = vmul.f32 0.6931472, %v619_v33  ;;  %v386_v63 = vpop.xlane.xlu1 %385 }
 0x22e   :  { %455 = vst [vmem:[#allocation5] sm:$0xff] %v439_v30  ;;  %v400_v35 = vpop.xlane.xlu0 %399  ;;  %v424_v36 = vmul.f32 0.6931472, %v621_v3  ;;  %630 = vlog2.f32 %v386_v63 }
 0x22f   :  { %v440_v37 = vsub.f32 %v788_v17, %v410_v34  ;;  %632 = vlog2.f32 %v400_v35 }
 0x230   :  { %v623_v38 = vpop.eup %622  ;;  %v447_v41 = vsub.f32 %v781_v10, %v424_v36 }
 0x231   :  { %v625_v9 = vpop.eup %624  ;;  %456 = vst [vmem:[#allocation5 + $0x8] sm:$0xff] %v440_v37  ;;  %v426_v42 = vmul.f32 0.6931472, %v623_v38  ;;  %v402_v5 = vpop.xlane.xlu1 %401 }
 0x232   :  { %v404_v43 = vpop.xlane.xlu0 %403  ;;  %463 = vst [vmem:[#allocation5 + $0x40] sm:$0xff] %v447_v41  ;;  %v420_v44 = vmul.f32 0.6931472, %v625_v9  ;;  %634 = vlog2.f32 %v402_v5 }
 0x233   :  { %v448_v45 = vsub.f32 %v786_v16, %v426_v42  ;;  %636 = vlog2.f32 %v404_v43 }
 0x234   :  { %v627_v46 = vpop.eup %626  ;;  %v445_v49 = vsub.f32 %v794_v24, %v420_v44 }
 0x235   :  { %v629_v50 = vpop.eup %628  ;;  %464 = vst [vmem:[#allocation5 + $0x48] sm:$0xff] %v448_v45  ;;  %v422_v17 = vmul.f32 0.6931472, %v627_v46  ;;  %v406_v51 = vpop.xlane.xlu1 %405 }
 0x236   :  { %461 = vst [vmem:[#allocation5 + $0x30] sm:$0xff] %v445_v49  ;;  %v416_v10 = vmul.f32 0.6931472, %v629_v50  ;;  %638 = vlog2.f32 %v406_v51 }
 0x237   :  { %v446_v52 = vsub.f32 %v792_v23, %v422_v17 }
 0x238   :  { %v631_v53 = vpop.eup %630  ;;  %v443_v54 = vsub.f32 %v800_v32, %v416_v10 }
 0x239   :  { %v633_v55 = vpop.eup %632  ;;  %462 = vst [vmem:[#allocation5 + $0x38] sm:$0xff] %v446_v52  ;;  %v418_v56 = vmul.f32 0.6931472, %v631_v53 }
 0x23a   :  { %459 = vst [vmem:[#allocation5 + $0x20] sm:$0xff] %v443_v54  ;;  %v432_v16 = vmul.f32 0.6931472, %v633_v55 }
 0x23b   :  { %v444_v57 = vsub.f32 %v798_v31, %v418_v56 }
 0x23c   :  { %v635_v24 = vpop.eup %634  ;;  %v451_v58 = vsub.f32 %v808_v40, %v432_v16 }
 0x23d   :  { %v637_v59 = vpop.eup %636  ;;  %460 = vst [vmem:[#allocation5 + $0x28] sm:$0xff] %v444_v57  ;;  %v434_v60 = vmul.f32 0.6931472, %v635_v24 }
 0x23e   :  { %467 = vst [vmem:[#allocation5 + $0x60] sm:$0xff] %v451_v58  ;;  %v436_v61 = vmul.f32 0.6931472, %v637_v59 }
 0x23f   :  { %v452_v23 = vsub.f32 %v805_v39, %v434_v60 }
 0x240   :  { %v639_v0 = vpop.eup %638  ;;  %v453_v32 = vsub.f32 %v813_v47, %v436_v61 }
 0x241   :  { %468 = vst [vmem:[#allocation5 + $0x68] sm:$0xff] %v452_v23  ;;  %v438_v1 = vmul.f32 0.6931472, %v639_v0 }
 0x242   :  { %469 = vst [vmem:[#allocation5 + $0x70] sm:$0xff] %v453_v32 }
 0x243   :  { %v454_v31 = vsub.f32 %v816_v48, %v438_v1 }
 0x245   :  { %470 = vst [vmem:[#allocation5 + $0x78] sm:$0xff] %v454_v31 }
 0x246   :  { %651 = shalt.err (!%p648_p4)
}
 0x247   :  { %s652_s24 = scalar_lea.hbm %s851_s3, 2048 }
 0x248   :  { %p653_p5 = scmp.ne.s32.totalorder %s851_s3, %s652_s24  ;;  %p656_p6 = scmp.lt.u32.totalorder %s652_s24, %s851_s3 }
 0x24a   :  { %p658_p7 = pnand %p656_p6, %p653_p5 }
 0x24c   :  { %661 = shalt.err (!%p658_p7)
}
 0x24d   :  { %s669_s28 = smov 128   ;;  %s670_s29 = smov 8  }
 0x24e   :  { %486 = dma.vmem_to_hbm [thread:$0]  %s481_s21, 2048, %s851_s3, [#allocation6], %s669_s28, %s669_s28, %s670_s29  }
 0x24f   :  { %666 = dma.done.wait [#allocation6], 2048  }
 0x250   :  { %667 = vsyncadd [#allocation6], 4294965248 }
 0x251   :  { %490 = vsyncpa [#allocation6], 1 }
 0x252   :  { %491 = vsyncmov [#allocation4] }
 0x255   :  { %s492_s5 = vpop.sfrf %491 }
 0x256   :  { %p537_p8 = scmp.ne.s32.totalorder %s492_s5, 0 }
 0x258   :  { %496 = shalt.err (%p537_p8)  }
 0x259   :  { %498 = vsyncmov [#allocation4 + $0x1] }
 0x25c   :  { %s499_s6 = vpop.sfrf %498 }
 0x25d   :  { %p538_p9 = scmp.ne.s32.totalorder %s499_s6, 0 }
 0x25f   :  { %503 = shalt.err (%p538_p9)  }

</bundles_post_ra>
